<compile_context>
chip_gen: v6e
topology: v6e:2x2x1
jax: 0.10.0
libtpu: 0.0.40
codegen_flags: <defaults>
</compile_context>

<pallas_src>
import numpy as np
import jax
import jax.numpy as jnp
from jax.experimental import pallas as pl
from jax.experimental.pallas import tpu as pltpu


def _round_up(x, m):
    return (x + m - 1) // m * m


def _pick_tile(n, desired):
    """Largest multiple of 128 that divides n (n is a multiple of 128) and is <= desired."""
    units = n // 128
    best = 1
    for d in range(1, units + 1):
        if d * 128 > desired:
            break
        if units % d == 0:
            best = d
    return best * 128


def _vmem_capacity_bytes():
    try:
        return int(pltpu.get_tpu_info().vmem_capacity_bytes)
    except Exception:
        return 64 << 20  # conservative (v7x per-TensorCore VMEM)


# --------------------------- Kernel 1: h = feat @ W -------------------------
def _linear_kernel(feat_ref, w_ref, h_ref):
    # TODO(synk): add a K-grid over F_in if in_feat grows into the multi-thousand range
    # so the (tile, F_in) feat block stays inside v7x's 64 MiB VMEM.
    h_ref[...] = jnp.dot(
        feat_ref[...].astype(jnp.bfloat16),
        w_ref[...].astype(jnp.bfloat16),
        preferred_element_type=jnp.float32,
    ).astype(h_ref.dtype)


# --------------------------- Kernel 2: out = adj @ h ------------------------
def _make_propagate_kernel(tile_k, max_nnz, h_resident):
    def kernel(cols_ref, counts_ref, adj_ref, h_ref, out_ref):
        i = pl.program_id(0)
        k = pl.program_id(1)

        @pl.when(k == 0)
        def _init():
            out_ref[...] = jnp.zeros_like(out_ref)

        # Only accumulate for real (non-padded) non-empty adjacency blocks.
        @pl.when(k < counts_ref[i])
        def _acc():
            if h_resident:
                col = cols_ref[i * max_nnz + k]
                row0 = pl.multiple_of(col * tile_k, tile_k)
                h_blk = h_ref[pl.ds(row0, tile_k), :]
            else:
                h_blk = h_ref[...]
            out_ref[...] += jnp.dot(
                adj_ref[...].astype(jnp.bfloat16),
                h_blk.astype(jnp.bfloat16),
                preferred_element_type=jnp.float32,
            )

    return kernel


def encoder_forward(feat, adj, weight, *, block_m=None, block_k=None):
    """feat: (N, F_in), adj: (N, N) dense, weight: (F_in, F_out) -> (N, F_out) float32."""
    N, F_in = feat.shape
    F_out = weight.shape[1]
    assert adj.shape == (N, N)
    assert weight.shape == (F_in, F_out)

    n_pad = _round_up(N, 128)
    f_out_pad = _round_up(F_out, 128)  # lane-dense output / MXU N-dim

    vmem_cap = _vmem_capacity_bytes()
    vmem_limit = (vmem_cap * 3) // 4        # ~48 MiB on v7x, ~96 MiB on v5e/v6e
    budget = int(vmem_limit * 0.8)

    # --- generation-aware, decoupled row / reduction tile selection ----------
    if vmem_cap >= (96 << 20):              # v5e / v6e: 128 MiB VMEM
        want_m, want_k = 1024, 4096
    else:                                   # v7x: 64 MiB VMEM per TensorCore
        want_m, want_k = 1024, 2048
    if block_m is not None:
        want_m = min(want_m, block_m)
    if block_k is not None:
        want_k = min(want_k, block_k)
    tile_m = _pick_tile(n_pad, want_m)
    tile_k = _pick_tile(n_pad, want_k)

    adj_isz = adj.dtype.itemsize
    h_bytes = n_pad * f_out_pad * 2         # bf16 h
    h_resident = h_bytes <= vmem_cap // 8   # ~8 MiB on v7x, ~16 MiB on v5e/v6e

    def footprint(tm, tk, resident):
        adj_buf = 2 * tm * tk * adj_isz                          # double-buffered adj
        h_buf = 2 * (h_bytes if resident else tk * f_out_pad * 2)
        out_buf = 2 * tm * f_out_pad * 4
        return adj_buf + h_buf + out_buf

    while footprint(tile_m, tile_k, h_resident) > budget and tile_k > 128:
        tile_k = _pick_tile(n_pad, tile_k // 2)
    if h_resident and footprint(tile_m, tile_k, h_resident) > budget:
        h_resident = False
    while footprint(tile_m, tile_k, h_resident) > budget and tile_m > 128:
        tile_m = _pick_tile(n_pad, tile_m // 2)

    # --- pad only when the node count is not already 128-aligned -------------
    if n_pad != N:
        feat_p = jnp.pad(feat, ((0, n_pad - N), (0, 0)))
        adj_p = jnp.pad(adj, ((0, n_pad - N), (0, n_pad - N)))
    else:
        feat_p, adj_p = feat, adj
    w_p = (
        jnp.pad(weight, ((0, 0), (0, f_out_pad - F_out)))
        if f_out_pad != F_out
        else weight
    )

    # ---- h = feat @ W : computed once, row-tiled, kept in bf16 for reuse ----
    tile_h = _pick_tile(n_pad, 512)
    h = pl.pallas_call(
        _linear_kernel,
        out_shape=jax.ShapeDtypeStruct((n_pad, f_out_pad), jnp.bfloat16),
        grid=(n_pad // tile_h,),
        in_specs=[
            pl.BlockSpec((tile_h, F_in), lambda i: (i, 0)),
            pl.BlockSpec((F_in, f_out_pad), lambda i: (0, 0)),
        ],
        out_specs=pl.BlockSpec((tile_h, f_out_pad), lambda i: (i, 0)),
        compiler_params=pltpu.CompilerParams(
            dimension_semantics=("parallel",),
            vmem_limit_bytes=vmem_limit,
        ),
    )(feat_p, w_p)

    # ---- block-sparsity structure: non-empty column tiles per row tile ------
    nb_r = n_pad // tile_m
    nb_c = n_pad // tile_k
    blk_mask = jnp.any(adj_p.reshape(nb_r, tile_m, nb_c, tile_k) != 0, axis=(1, 3))
    blk_mask = np.asarray(jax.device_get(blk_mask))
    counts = np.zeros((nb_r,), np.int32)
    nz_cols = []
    for i in range(nb_r):
        nz = np.nonzero(blk_mask[i])[0].astype(np.int32)
        counts[i] = nz.size
        nz_cols.append(nz)
    max_nnz = max(1, int(counts.max()) if nb_r else 1)
    cols = np.zeros((nb_r, max_nnz), np.int32)
    for i in range(nb_r):
        nz = nz_cols[i]
        if nz.size:
            cols[i, : nz.size] = nz
            cols[i, nz.size:] = nz[-1]  # repeat last index -> padded steps re-use same block (no new DMA)
    cols_flat = jnp.asarray(cols.reshape(-1))
    counts_j = jnp.asarray(counts)

    # ---- out = adj @ h : sparse (row-tile, nnz-col-tile) grid ----------------
    adj_spec = pl.BlockSpec(
        (tile_m, tile_k), lambda i, k, c, n: (i, c[i * max_nnz + k])
    )
    if h_resident:
        h_spec = pl.BlockSpec((n_pad, f_out_pad), lambda i, k, c, n: (0, 0))
    else:
        h_spec = pl.BlockSpec(
            (tile_k, f_out_pad), lambda i, k, c, n: (c[i * max_nnz + k], 0)
        )
    out_spec = pl.BlockSpec((tile_m, f_out_pad), lambda i, k, c, n: (i, 0))

    nnz_blocks = int(counts.sum())
    cost = pl.CostEstimate(
        flops=2 * nnz_blocks * tile_m * tile_k * f_out_pad
        + 2 * n_pad * F_in * f_out_pad,
        transcendentals=0,
        bytes_accessed=int(
            nnz_blocks * tile_m * tile_k * adj_isz
            + (h_bytes if h_resident else nnz_blocks * tile_k * f_out_pad * 2)
            + n_pad * f_out_pad * 4
        ),
    )

    out_p = pl.pallas_call(
        _make_propagate_kernel(tile_k, max_nnz, h_resident),
        out_shape=jax.ShapeDtypeStruct((n_pad, f_out_pad), jnp.float32),
        grid_spec=pltpu.PrefetchScalarGridSpec(
            num_scalar_prefetch=2,
            grid=(nb_r, max_nnz),
            in_specs=[adj_spec, h_spec],
            out_specs=out_spec,
        ),
        compiler_params=pltpu.CompilerParams(
            dimension_semantics=("parallel", "arbitrary"),
            vmem_limit_bytes=vmem_limit,
        ),
        cost_estimate=cost,
    )(cols_flat, counts_j, adj_p, h)

    return out_p[:N, :F_out]


def xavier_uniform(key, fan_in, fan_out, dtype=jnp.float32):
    # Matches torch.nn.init.xavier_uniform_ bound.
    bound = (6.0 / (fan_in + fan_out)) ** 0.5
    return jax.random.uniform(
        key, (fan_in, fan_out), dtype=dtype, minval=-bound, maxval=bound
    )


if __name__ == "__main__":
    # Small-but-grid-exercising problem: 256 graph nodes, 64 -> 32 features.
    N, in_feat, out_feat = 256, 64, 32

    key = jax.random.PRNGKey(0)
    k_feat, k_adj, k_w = jax.random.split(key, 3)

    feat = jax.random.normal(k_feat, (N, in_feat), dtype=jnp.float32)

    # Sparse symmetric row-normalized adjacency with self loops (typical GCN input).
    a = (jax.random.uniform(k_adj, (N, N)) > 0.9).astype(jnp.float32)
    a = jnp.maximum(a, a.T) + jnp.eye(N, dtype=jnp.float32)
    adj = a / jnp.sum(a, axis=1, keepdims=True)

    weight = xavier_uniform(k_w, in_feat, out_feat)

    # block_m=block_k=128 -> (2, <=2) grid at N=256, exercising the scalar-prefetched
    # block-sparse reduction and the VMEM-resident h path.
    out = encoder_forward(feat, adj, weight, block_m=128, block_k=128)
    out = jax.block_until_ready(out)

    # Reference with matched bf16 input quantization and f32 accumulation.
    feat_q = feat.astype(jnp.bfloat16).astype(jnp.float32)
    w_q = weight.astype(jnp.bfloat16).astype(jnp.float32)
    adj_q = adj.astype(jnp.bfloat16).astype(jnp.float32)
    h_q = (feat_q @ w_q).astype(jnp.bfloat16).astype(jnp.float32)
    ref = adj_q @ h_q

    assert out.shape == (N, out_feat)
    assert jnp.allclose(out, ref, atol=2e-3, rtol=2e-3), "mismatch vs reference"

    print("KERNEL_OK")
</pallas_src>

<mosaic_0001>
module attributes {stable_mosaic.version = 11 : i64} {
  func.func @_linear_kernel(%arg0: i32, %arg1: memref<256x64xf32, #tpu.memory_space<vmem>>, %arg2: memref<64x128xf32, #tpu.memory_space<vmem>>, %arg3: memref<256x128xbf16, #tpu.memory_space<vmem>>) attributes {dimension_semantics = [#tpu.dimension_semantics<parallel>], iteration_bounds = array<i64: 1>, scalar_prefetch = 0 : i64, scratch_operands = 0 : i64, tpu.core_type = #tpu.core_type<tc>, window_params = [{transform_indices = @transform_0, window_bounds = array<i64: 256, 64>}, {pipeline_mode = #tpu.pipeline_mode<synchronous>, transform_indices = @transform_1, window_bounds = array<i64: 64, 128>}, {transform_indices = @transform_2, window_bounds = array<i64: 256, 128>}]} {
    %c0 = arith.constant 0 : index
    %c0_0 = arith.constant 0 : index
    %0 = vector.load %arg1[%c0, %c0_0] : memref<256x64xf32, #tpu.memory_space<vmem>>, vector<256x64xf32>
    %1 = arith.truncf %0 : vector<256x64xf32> to vector<256x64xbf16>
    %c0_1 = arith.constant 0 : index
    %c0_2 = arith.constant 0 : index
    %2 = vector.load %arg2[%c0_1, %c0_2] : memref<64x128xf32, #tpu.memory_space<vmem>>, vector<64x128xf32>
    %3 = arith.truncf %2 : vector<64x128xf32> to vector<64x128xbf16>
    %cst = arith.constant dense<0.000000e+00> : vector<256x128xf32>
    %4 = tpu.matmul %1, %3, %cst {dimension_numbers = #tpu.dot_dimension_numbers<[1], [0], [0], [1], [0, 0, 1, 1], [], []>} : vector<256x64xbf16>, vector<64x128xbf16>, vector<256x128xf32> -> vector<256x128xf32>
    %5 = arith.truncf %4 : vector<256x128xf32> to vector<256x128xbf16>
    %c0_3 = arith.constant 0 : index
    %c0_4 = arith.constant 0 : index
    %6 = vector.load %arg3[%c0_3, %c0_4] : memref<256x128xbf16, #tpu.memory_space<vmem>>, vector<256x128xbf16>
    tpu.vector_store %arg3[%c0_3, %c0_4], %5 {strides = array<i32>} : memref<256x128xbf16, #tpu.memory_space<vmem>>, vector<256x128xbf16>,
    return
  }
  func.func @transform_0(%arg0: i32) -> (i32, i32) {
    %c0_i32 = arith.constant 0 : i32
    %c0_i32_0 = arith.constant 0 : i32
    return %arg0, %c0_i32 : i32, i32
  }
  func.func @transform_1(%arg0: i32) -> (i32, i32) {
    %c0_i32 = arith.constant 0 : i32
    %c0_i32_0 = arith.constant 0 : i32
    %c0_i32_1 = arith.constant 0 : i32
    return %c0_i32, %c0_i32_0 : i32, i32
  }
  func.func @transform_2(%arg0: i32) -> (i32, i32) {
    %c0_i32 = arith.constant 0 : i32
    %c0_i32_0 = arith.constant 0 : i32
    return %arg0, %c0_i32 : i32, i32
  }
}

</mosaic_0001>

<bundles_post_ra>
// kernel: tpu_custom_call.1
= control target key start
LH: loop header
LB: loop body
LE: loop exit
PB: predicated region body
PF: predicated region fallthrough
CT: control target
= control target key end

     0   :  { %vm73_vm0 = vcmask 523264   ;;  %s884_s0 = inlined_call_operand.vmem [shape: f32[256,64], index: 0, kind: input, shape index: {}]   ;;  %s885_s1 = inlined_call_operand.vmem [shape: f32[64,128], index: 1, kind: input, shape index: {}]   ;;  %s886_s2 = inlined_call_operand.hbm [shape: bf16[256,128], index: 2, kind: output, shape index: {}]  }
   0x1   :  { %v67_v0 = vld [vmem:[%s885_s1 + $0x30] sm:$0xff]  ;;  %v68_v1 = vld [vmem:[%s885_s1 + $0x38] sm:$0xff]  ;;  %v65_v2 = vld [vmem:[%s885_s1 + $0x20] sm:$0xff] }
   0x2   :  { %v72_v3 = vpack.c.bf16 %v68_v1, %v67_v0  ;;  %v66_v4 = vld [vmem:[%s885_s1 + $0x28] sm:$0xff]  ;;  %v63_v6 = vld [vmem:[%s885_s1 + $0x10] sm:$0xff]  ;;  %v64_v7 = vld [vmem:[%s885_s1 + $0x18] sm:$0xff] }
   0x3   :  { %v71_v5 = vpack.c.bf16 %v66_v4, %v65_v2  ;;  %v13_v8 = vld [vmem:[%s884_s0] sm:$0xff]  ;;  %v14_v9 = vld [vmem:[%s884_s0 + $0x8] sm:$0xff]  ;;  %v70_v14 = vpack.c.bf16 %v64_v7, %v63_v6  ;;  %v15_v18 = vld [vmem:[%s884_s0 + $0x10] sm:$0xff] }
   0x4   :  { %654 = vmatprep.subr.bf16.mxu0 %v72_v3  ;;  %694 = vmatprep.subr.bf16.mxu1 %v72_v3  ;;  %v29_v10 = vld [vmem:[%s884_s0 + $0x80] sm:$0xff]  ;;  %v30_v11 = vld [vmem:[%s884_s0 + $0x88] sm:$0xff]  ;;  %v45_v12 = vpack.c.bf16 %v14_v9, %v13_v8  ;;  %v16_v19 = vld [vmem:[%s884_s0 + $0x18] sm:$0xff] }
   0x5   :  { %655 = vmatpush3.bf16.msra.mxu0 %v72_v3  ;;  %698 = vmatpush3.bf16.msra.mxu1 %v72_v3  ;;  %v53_v13 = vpack.c.bf16 %v30_v11, %v29_v10  ;;  %v61_v15 = vld [vmem:[%s885_s1] sm:$0xff]  ;;  %v62_v16 = vld [vmem:[%s885_s1 + $0x8] sm:$0xff]  ;;  %v31_v20 = vld [vmem:[%s884_s0 + $0x90] sm:$0xff] }
   0x6   :  { %656 = vmatprep.subr.bf16.mxu0 %v71_v5  ;;  %695 = vmatprep.subr.bf16.mxu1 %v71_v5  ;;  %v69_v17 = vpack.c.bf16 %v62_v16, %v61_v15  ;;  %v32_v21 = vld [vmem:[%s884_s0 + $0x98] sm:$0xff]  ;;  %v17_v22 = vld [vmem:[%s884_s0 + $0x20] sm:$0xff]  ;;  %v18_v23 = vld [vmem:[%s884_s0 + $0x28] sm:$0xff] }
   0x7   :  { %662 = vmatprep.mubr.msk.bf16.mxu0 %vm73_vm0, %v45_v12  ;;  %678 = vmatprep.mubr.msk.bf16.mxu1 %vm73_vm0, %v53_v13  ;;  %v33_v24 = vld [vmem:[%s884_s0 + $0xa0] sm:$0xff]  ;;  %v34_v25 = vld [vmem:[%s884_s0 + $0xa8] sm:$0xff] }
   0x9   :  { %657 = vmatpush3.bf16.msra.mxu0 %v71_v5  ;;  %699 = vmatpush3.bf16.msra.mxu1 %v71_v5 }
   0xa   :  { %658 = vmatprep.subr.bf16.mxu0 %v70_v14  ;;  %696 = vmatprep.subr.bf16.mxu1 %v70_v14 }
   0xd   :  { %659 = vmatpush3.bf16.msra.mxu0 %v70_v14  ;;  %700 = vmatpush3.bf16.msra.mxu1 %v70_v14 }
   0xe   :  { %660 = vmatprep.subr.bf16.mxu0 %v69_v17  ;;  %697 = vmatprep.subr.bf16.mxu1 %v69_v17 }
   0xf   :  { %7 = vsyncpa [#allocation3], 0  ;;  %v46_v26 = vpack.c.bf16 %v16_v19, %v15_v18  ;;  %v54_v27 = vpack.c.bf16 %v32_v21, %v31_v20  ;;  %v47_v28 = vpack.c.bf16 %v18_v23, %v17_v22  ;;  %v55_v29 = vpack.c.bf16 %v34_v25, %v33_v24  ;;  %v19_v30 = vld [vmem:[%s884_s0 + $0x30] sm:$0xff]  ;;  %v20_v31 = vld [vmem:[%s884_s0 + $0x38] sm:$0xff] }
  0x10   :  { %v35_v32 = vld [vmem:[%s884_s0 + $0xb0] sm:$0xff]  ;;  %v36_v33 = vld [vmem:[%s884_s0 + $0xb8] sm:$0xff]  ;;  %v21_v34 = vld [vmem:[%s884_s0 + $0x40] sm:$0xff]  ;;  %v48_v38 = vpack.c.bf16 %v20_v31, %v19_v30 }
  0x11   :  { %661 = vmatpush3.bf16.msra.mxu0 %v69_v17  ;;  %701 = vmatpush3.bf16.msra.mxu1 %v69_v17  ;;  %v22_v35 = vld [vmem:[%s884_s0 + $0x48] sm:$0xff]  ;;  %v37_v36 = vld [vmem:[%s884_s0 + $0xc0] sm:$0xff]  ;;  %v56_v39 = vpack.c.bf16 %v36_v33, %v35_v32  ;;  %v23_v42 = vld [vmem:[%s884_s0 + $0x50] sm:$0xff] }
  0x12   :  { %v38_v37 = vld [vmem:[%s884_s0 + $0xc8] sm:$0xff]  ;;  %v49_v40 = vpack.c.bf16 %v22_v35, %v21_v34  ;;  %v24_v43 = vld [vmem:[%s884_s0 + $0x58] sm:$0xff]  ;;  %v39_v44 = vld [vmem:[%s884_s0 + $0xd0] sm:$0xff] }
  0x13   :  { %v57_v41 = vpack.c.bf16 %v38_v37, %v37_v36  ;;  %v40_v45 = vld [vmem:[%s884_s0 + $0xd8] sm:$0xff]  ;;  %v25_v46 = vld [vmem:[%s884_s0 + $0x60] sm:$0xff]  ;;  %v26_v47 = vld [vmem:[%s884_s0 + $0x68] sm:$0xff]  ;;  %v50_v50 = vpack.c.bf16 %v24_v43, %v23_v42 }
  0x14   :  { %663 = vmatmul.mubr.msk.bf16.vlgmr.msra.gmra.mxu0 %vm73_vm0, %v46_v26  ;;  %679 = vmatmul.mubr.msk.bf16.vlgmr.msra.gmra.mxu1 %vm73_vm0, %v54_v27  ;;  %v41_v48 = vld [vmem:[%s884_s0 + $0xe0] sm:$0xff]  ;;  %v42_v49 = vld [vmem:[%s884_s0 + $0xe8] sm:$0xff]  ;;  %v58_v51 = vpack.c.bf16 %v40_v45, %v39_v44  ;;  %v51_v52 = vpack.c.bf16 %v26_v47, %v25_v46  ;;  %v27_v54 = vld [vmem:[%s884_s0 + $0x70] sm:$0xff] }
  0x15   :  { %666 = vmatprep.mubr.msk.bf16.mxu0 %vm73_vm0, %v47_v28  ;;  %682 = vmatprep.mubr.msk.bf16.mxu1 %vm73_vm0, %v55_v29  ;;  %v59_v53 = vpack.c.bf16 %v42_v49, %v41_v48  ;;  %v28_v55 = vld [vmem:[%s884_s0 + $0x78] sm:$0xff]  ;;  %v43_v56 = vld [vmem:[%s884_s0 + $0xf0] sm:$0xff] }
  0x16   :  { %v44_v57 = vld [vmem:[%s884_s0 + $0xf8] sm:$0xff]  ;;  %v52_v58 = vpack.c.bf16 %v28_v55, %v27_v54  ;;  %s727_s0 = smov [#allocation2]  }
  0x17   :  { %v60_v59 = vpack.c.bf16 %v44_v57, %v43_v56  ;;  %s448_s3 = sshll.u32 %s727_s0, 4  ;;  %s449_s3 = int_to_ptr.vmem [resolvable:$true] %s448_s3 }
  0x18   :  { %s705_s4 = scalar_lea.vmem %s449_s3, 2048  ;;  %p710_p1 = scmp.lt.s32.totalorder %s449_s3, %s449_s3 }
  0x19   :  { %p706_p0 = scmp.ne.s32.totalorder %s449_s3, %s705_s4  ;;  %p711_p2 = scmp.lt.s32.totalorder %s705_s4, %s705_s4 }
  0x1b   :  { %p712_p3 = por %p711_p2, %p710_p1 }
  0x1c   :  { %667 = vmatmul.mubr.msk.bf16.gmra.mxu0 %vm73_vm0, %v48_v38  ;;  %683 = vmatmul.mubr.msk.bf16.gmra.mxu1 %vm73_vm0, %v56_v39 }
  0x1d   :  { %670 = vmatprep.mubr.msk.bf16.mxu0 %vm73_vm0, %v49_v40  ;;  %686 = vmatprep.mubr.msk.bf16.mxu1 %vm73_vm0, %v57_v41  ;;  %p713_p4 = pnand %p712_p3, %p706_p0 }
  0x24   :  { %671 = vmatmul.mubr.msk.bf16.gmra.mxu0 %vm73_vm0, %v50_v50  ;;  %687 = vmatmul.mubr.msk.bf16.gmra.mxu1 %vm73_vm0, %v58_v51 }
  0x25   :  { %674 = vmatprep.mubr.msk.bf16.mxu0 %vm73_vm0, %v51_v52  ;;  %690 = vmatprep.mubr.msk.bf16.mxu1 %vm73_vm0, %v59_v53 }
  0x2c   :  { %675 = vmatmul.mubr.msk.bf16.gmra.mxu0 %vm73_vm0, %v52_v58  ;;  %691 = vmatmul.mubr.msk.bf16.gmra.mxu1 %vm73_vm0, %v60_v59 }
  0xd4   :  { %v664_v60 = vpop.f32.mrf.mxu0  ;;  %v680_v61 = vpop.f32.mrf.mxu1 }
  0xd6   :  { %v156_v62 = vpop.f32.mrf.mxu0  ;;  %v220_v63 = vpop.f32.mrf.mxu1 }
  0xd8   :  { %v665_v0 = vpop.f32.mrf.mxu0  ;;  %v681_v1 = vpop.f32.mrf.mxu1 }
  0xd9   :  { %v547_v2 = vpack.c.bf16 %v665_v0, %v664_v60  ;;  %v587_v3 = vpack.c.bf16 %v681_v1, %v680_v61 }
  0xda   :  { %v159_v4 = vpop.f32.mrf.mxu0  ;;  %v223_v5 = vpop.f32.mrf.mxu1 }
  0xdb   :  { %619 = vst [vmem:[#allocation2 + $0x8] sm:$0xff] %v547_v2   ;;  %627 = vst [vmem:[#allocation2 + $0x48] sm:$0xff] %v587_v3   ;;  %v542_v6 = vpack.c.bf16 %v159_v4, %v156_v62  ;;  %v582_v7 = vpack.c.bf16 %v223_v5, %v220_v63 }
  0xdc   :  { %v668_v8 = vpop.f32.mrf.mxu0  ;;  %v684_v9 = vpop.f32.mrf.mxu1 }
  0xdd   :  { %543 = vst [vmem:[#allocation2] sm:$0xff] %v542_v6   ;;  %626 = vst [vmem:[#allocation2 + $0x40] sm:$0xff] %v582_v7  }
  0xde   :  { %v172_v10 = vpop.f32.mrf.mxu0  ;;  %v236_v11 = vpop.f32.mrf.mxu1 }
  0xe0   :  { %v669_v12 = vpop.f32.mrf.mxu0  ;;  %v685_v13 = vpop.f32.mrf.mxu1 }
  0xe1   :  { %v557_v14 = vpack.c.bf16 %v669_v12, %v668_v8  ;;  %v597_v15 = vpack.c.bf16 %v685_v13, %v684_v9 }
  0xe2   :  { %v175_v16 = vpop.f32.mrf.mxu0  ;;  %v239_v17 = vpop.f32.mrf.mxu1 }
  0xe3   :  { %621 = vst [vmem:[#allocation2 + $0x18] sm:$0xff] %v557_v14   ;;  %629 = vst [vmem:[#allocation2 + $0x58] sm:$0xff] %v597_v15   ;;  %v552_v18 = vpack.c.bf16 %v175_v16, %v172_v10  ;;  %v592_v19 = vpack.c.bf16 %v239_v17, %v236_v11 }
  0xe4   :  { %v672_v20 = vpop.f32.mrf.mxu0  ;;  %v688_v21 = vpop.f32.mrf.mxu1 }
  0xe5   :  { %620 = vst [vmem:[#allocation2 + $0x10] sm:$0xff] %v552_v18   ;;  %628 = vst [vmem:[#allocation2 + $0x50] sm:$0xff] %v592_v19  }
  0xe6   :  { %v188_v22 = vpop.f32.mrf.mxu0  ;;  %v252_v23 = vpop.f32.mrf.mxu1 }
  0xe8   :  { %v673_v24 = vpop.f32.mrf.mxu0  ;;  %v689_v25 = vpop.f32.mrf.mxu1 }
  0xe9   :  { %v567_v26 = vpack.c.bf16 %v673_v24, %v672_v20  ;;  %v607_v27 = vpack.c.bf16 %v689_v25, %v688_v21 }
  0xea   :  { %v191_v28 = vpop.f32.mrf.mxu0  ;;  %v255_v29 = vpop.f32.mrf.mxu1 }
  0xeb   :  { %623 = vst [vmem:[#allocation2 + $0x28] sm:$0xff] %v567_v26   ;;  %631 = vst [vmem:[#allocation2 + $0x68] sm:$0xff] %v607_v27   ;;  %v562_v30 = vpack.c.bf16 %v191_v28, %v188_v22  ;;  %v602_v31 = vpack.c.bf16 %v255_v29, %v252_v23 }
  0xec   :  { %v676_v32 = vpop.f32.mrf.mxu0  ;;  %v692_v33 = vpop.f32.mrf.mxu1 }
  0xed   :  { %622 = vst [vmem:[#allocation2 + $0x20] sm:$0xff] %v562_v30   ;;  %630 = vst [vmem:[#allocation2 + $0x60] sm:$0xff] %v602_v31  }
  0xee   :  { %v204_v34 = vpop.f32.mrf.mxu0  ;;  %v268_v35 = vpop.f32.mrf.mxu1 }
  0xf0   :  { %v677_v36 = vpop.f32.mrf.mxu0  ;;  %v693_v37 = vpop.f32.mrf.mxu1 }
  0xf1   :  { %v577_v38 = vpack.c.bf16 %v677_v36, %v676_v32  ;;  %v617_v39 = vpack.c.bf16 %v693_v37, %v692_v33 }
  0xf2   :  { %v207_v40 = vpop.f32.mrf.mxu0  ;;  %v271_v41 = vpop.f32.mrf.mxu1 }
  0xf3   :  { %625 = vst [vmem:[#allocation2 + $0x38] sm:$0xff] %v577_v38   ;;  %633 = vst [vmem:[#allocation2 + $0x78] sm:$0xff] %v617_v39   ;;  %v572_v42 = vpack.c.bf16 %v207_v40, %v204_v34  ;;  %v612_v43 = vpack.c.bf16 %v271_v41, %v268_v35 }
  0xf5   :  { %624 = vst [vmem:[#allocation2 + $0x30] sm:$0xff] %v572_v42   ;;  %632 = vst [vmem:[#allocation2 + $0x70] sm:$0xff] %v612_v43  }
  0xf6   :  { %716 = shalt.err (!%p713_p4)
}
  0xf7   :  { %s728_s5 = smov 64   ;;  %s729_s6 = smov 4  }
  0xf8   :  { %454 = dma.vmem_to_hbm [thread:$0]  %s449_s3, 2048, %s886_s2, [#allocation3], %s728_s5, %s728_s5, %s729_s6  }
  0xf9   :  { %725 = dma.done.wait [#allocation3], 2048  }
  0xfa   :  { %726 = vsyncadd [#allocation3], 4294965248 }
  0xfb   :  { %458 = vsyncpa [#allocation3], 1 }

</bundles_post_ra>
